<compile_context>
chip_gen: v5e
topology: v5e:2x2
jax: 0.10.0
libtpu: 0.0.40
codegen_flags: <defaults>
</compile_context>

<pallas_src>
import functools

import numpy as np
import jax
import jax.numpy as jnp
from jax import lax
from jax.experimental import pallas as pl
from jax.experimental.pallas import tpu as pltpu

BOXCLS_LAYERS_BY_COEF = [3, 3, 3, 4, 4, 4, 5, 5]


# ----------------------------------------------------------------------------
# pltpu.roll direction probe (tiny one-time pallas_call, cached).
# ----------------------------------------------------------------------------
_ROLL_TOWARD_HIGHER = None


def _roll_toward_higher():
    """True iff pltpu.roll(x, s, axis)[i] == x[i - s] (np.roll convention)."""
    global _ROLL_TOWARD_HIGHER
    if _ROLL_TOWARD_HIGHER is None:
        def probe(x_ref, o_ref):
            o_ref[...] = pltpu.roll(x_ref[...], 1, axis=1)

        x = jnp.tile(jnp.arange(128, dtype=jnp.float32), (8, 1))
        y = pl.pallas_call(
            probe, out_shape=jax.ShapeDtypeStruct((8, 128), jnp.float32))(x)
        _ROLL_TOWARD_HIGHER = bool(np.asarray(y)[0, 0] == 127.0)
    return _ROLL_TOWARD_HIGHER


# ----------------------------------------------------------------------------
# Fused Classifier + Regressor kernel (one chunk of `nb` samples per grid step)
# ----------------------------------------------------------------------------
def _head_kernel(x_ref,
                 w0_ref,
                 cls_w_ref, cls_s_ref, cls_b_ref, cls_hw_ref, cls_hb_ref,
                 box_w_ref, box_s_ref, box_b_ref, box_hw_ref, box_hb_ref,
                 cls_out_ref, box_out_ref,
                 patch_ref, xcat_ref,
                 *, num_layers, H, W, C, nb, roll_up):
    P = H * W
    NP = nb * P

    # Flat lane index -> (sample-local row, col); reused by every im2col call
    # and by the per-sample BN lane masks.  Computed once.
    q = lax.broadcasted_iota(jnp.int32, (1, NP), 1)
    p = q % P
    hh = p // W
    ww = p % W

    # 3x3 tap table: (is_center, lane offset, validity mask).  Masks zero taps
    # that fall outside the "same"-padded window; they also cancel the circular
    # wrap of pltpu.roll across sample boundaries and the array end.
    taps = []
    for dy in (-1, 0, 1):
        for dx in (-1, 0, 1):
            valid = None
            if dy < 0:
                valid = hh >= -dy
            elif dy > 0:
                valid = hh < H - dy
            if dx < 0:
                c = ww >= -dx
                valid = c if valid is None else (valid & c)
            elif dx > 0:
                c = ww < W - dx
                valid = c if valid is None else (valid & c)
            taps.append((dy == 0 and dx == 0, dy * W + dx, valid))

    def im2col(x_f32):
        # x_f32: (C, NP) f32.  Tap t occupies rows [t*C, (t+1)*C) of the
        # persistent bf16 patch scratch (no concatenate, no fresh buffers).
        for t, (center, off, valid) in enumerate(taps):
            if center:
                patch_ref[t * C:(t + 1) * C, :] = x_f32.astype(jnp.bfloat16)
            else:
                shift = (-off) % NP if roll_up else off % NP
                shifted = pltpu.roll(x_f32, shift, axis=1)
                patch_ref[t * C:(t + 1) * C, :] = jnp.where(
                    valid, shifted, 0.0).astype(jnp.bfloat16)

    def lane_bn(ref, l):
        # ref: (nb, L, C, 1) f32 -> per-lane broadcast with sample j occupying
        # lanes [j*P, (j+1)*P).  nb <= 5 so the where-chain is a few VPU ops.
        v = ref[0, l]                                   # (C, 1)
        for j in range(1, nb):
            v = jnp.where(q >= j * P, ref[j, l], v)     # (C, NP) after 1st where
        return v

    def bn_swish(y, s_ref, b_ref, l):
        # f32 epilogue: eval-mode BN (scale/shift, incl. pointwise bias) + swish
        y = y * lane_bn(s_ref, l) + lane_bn(b_ref, l)
        return y * jax.nn.sigmoid(y)                    # MemoryEfficientSwish

    # ---- stage the nb samples side by side along lanes ----------------------
    for j in range(nb):
        xcat_ref[:, j * P:(j + 1) * P] = x_ref[j]

    # ---- layer 0: shared patch, fused classifier+regressor matmul -----------
    im2col(xcat_ref[...])
    y0 = jnp.dot(w0_ref[...], patch_ref[...],
                 preferred_element_type=jnp.float32)    # (2C, NP) f32
    x_cls = bn_swish(y0[:C], cls_s_ref, cls_b_ref, 0)
    x_box = bn_swish(y0[C:], box_s_ref, box_b_ref, 0)

    def run_tail(x, w_ref, s_ref, b_ref, hw_ref, hb_ref, out_ref, apply_sigmoid):
        for l in range(1, num_layers):
            # SeparableConvBlock (dw3x3 + pw1x1) as one bf16 MXU matmul with
            # f32 accumulation; BN + bias + swish as f32 epilogue.
            im2col(x)
            y = jnp.dot(w_ref[l - 1], patch_ref[...],
                        preferred_element_type=jnp.float32)
            x = bn_swish(y, s_ref, b_ref, l)
        # header SeparableConvBlock (C -> C_out), conv bias, no BN / swish
        im2col(x)
        y = jnp.dot(hw_ref[...], patch_ref[...],
                    preferred_element_type=jnp.float32) + hb_ref[...]
        if apply_sigmoid:                               # Classifier only
            y = jax.nn.sigmoid(y)
        for j in range(nb):                             # lane-dense stores
            out_ref[j] = y[:, j * P:(j + 1) * P]

    run_tail(x_cls, cls_w_ref, cls_s_ref, cls_b_ref, cls_hw_ref, cls_hb_ref,
             cls_out_ref, True)
    run_tail(x_box, box_w_ref, box_s_ref, box_b_ref, box_hw_ref, box_hb_ref,
             box_out_ref, False)


# ----------------------------------------------------------------------------
# Pallas wrapper: one FPN level, both subnets, whole batch
# ----------------------------------------------------------------------------
def _pick_batch_chunk(N, P, target_lanes=512):
    """Largest divisor nb of N with nb*P <= max(target_lanes, P).

    Lane-batches samples on small FPN levels; keeps a per-sample 'parallel'
    grid (megacore-friendly, VMEM-friendly) on large levels.
    """
    cap = max(target_lanes, P)
    for nb in range(N, 0, -1):
        if N % nb == 0 and nb * P <= cap:
            return nb
    return 1


def run_head(x_nchw, w0_joint, cls_p, box_p):
    N, C, H, W = x_nchw.shape
    P = H * W
    L = cls_p["w"].shape[0]
    C_cls = cls_p["hw"].shape[0]
    C_box = box_p["hw"].shape[0]
    assert N <= cls_p["scale"].shape[0], \
        "the torch module only carries 5 per-sample BN lists (N <= 5)"
    assert L >= 2

    nb = _pick_batch_chunk(N, P)
    G = N // nb

    x = x_nchw.reshape(N, C, P).astype(jnp.float32)      # free reshape, no transpose

    kernel = functools.partial(
        _head_kernel, num_layers=L, H=H, W=W, C=C, nb=nb,
        roll_up=_roll_toward_higher())

    const2 = lambda g: (0, 0)
    const3 = lambda g: (0, 0, 0)
    chunk3 = lambda g: (g, 0, 0)
    chunk4 = lambda g: (g, 0, 0, 0)

    cls_out, box_out = pl.pallas_call(
        kernel,
        out_shape=(jax.ShapeDtypeStruct((N, C_cls, P), jnp.float32),
                   jax.ShapeDtypeStruct((N, C_box, P), jnp.float32)),
        grid_spec=pltpu.PrefetchScalarGridSpec(
            num_scalar_prefetch=0,
            grid=(G,),
            in_specs=[
                pl.BlockSpec((nb, C, P), chunk3),          # features (sample chunk)
                pl.BlockSpec((2 * C, 9 * C), const2),      # fused layer-0 weights
                pl.BlockSpec((L - 1, C, 9 * C), const3),   # cls layers 1..L-1 (resident)
                pl.BlockSpec((nb, L, C, 1), chunk4),       # cls BN scale (per sample)
                pl.BlockSpec((nb, L, C, 1), chunk4),       # cls BN shift + conv bias
                pl.BlockSpec((C_cls, 9 * C), const2),      # cls header weights
                pl.BlockSpec((C_cls, 1), const2),          # cls header bias
                pl.BlockSpec((L - 1, C, 9 * C), const3),   # box layers 1..L-1 (resident)
                pl.BlockSpec((nb, L, C, 1), chunk4),       # box BN scale
                pl.BlockSpec((nb, L, C, 1), chunk4),       # box BN shift + conv bias
                pl.BlockSpec((C_box, 9 * C), const2),      # box header weights
                pl.BlockSpec((C_box, 1), const2),          # box header bias
            ],
            out_specs=[pl.BlockSpec((nb, C_cls, P), chunk3),
                       pl.BlockSpec((nb, C_box, P), chunk3)],
            scratch_shapes=[
                pltpu.VMEM((9 * C, nb * P), jnp.bfloat16),  # persistent im2col patch
                pltpu.VMEM((C, nb * P), jnp.float32),       # lane-batched layer-0 input
            ],
        ),
        compiler_params=pltpu.CompilerParams(
            dimension_semantics=("parallel",),
            vmem_limit_bytes=32 * 1024 * 1024),
    )(x, w0_joint,
      cls_p["w_rest"], cls_p["scale"][:N], cls_p["bias"][:N],
      cls_p["hw"], cls_p["hb"],
      box_p["w_rest"], box_p["scale"][:N], box_p["bias"][:N],
      box_p["hw"], box_p["hb"])

    # trailing-dim split is a free reshape -> final NCHW layout
    return (cls_out.reshape(N, C_cls, H, W),
            box_out.reshape(N, C_box, H, W))


# ----------------------------------------------------------------------------
# Parameter construction + host-side merging (mirrors torch module shapes)
# ----------------------------------------------------------------------------
def init_subnet_params(key, in_channels, out_channels, num_layers, bn_eps=1e-3):
    C, L, Co = in_channels, num_layers, out_channels
    # TODO(synk): if C is not a multiple of 16 (bf16 sublane pack), pad C here
    # so the 9 patch row-segments and the weight K dim stay dense.
    ks = jax.random.split(key, 10)
    dw = jax.random.normal(ks[0], (L, 3, 3, C), jnp.float32) * 0.1       # depthwise, no bias
    pw = jax.random.normal(ks[1], (L, C, C), jnp.float32) / np.sqrt(C)   # pointwise
    pwb = jax.random.normal(ks[2], (L, C), jnp.float32) * 0.05
    gamma = 1.0 + 0.1 * jax.random.normal(ks[3], (5, L, C), jnp.float32)
    beta = 0.05 * jax.random.normal(ks[4], (5, L, C), jnp.float32)
    rmean = 0.05 * jax.random.normal(ks[5], (5, L, C), jnp.float32)
    rvar = 1.0 + 0.1 * jax.random.uniform(ks[6], (5, L, C), jnp.float32)
    # TODO(synk): train-mode BatchNorm (per-batch statistics) not implemented;
    # eval-mode running stats are applied as an f32 scale/shift epilogue.
    scale = gamma / jnp.sqrt(rvar + bn_eps)                              # (5, L, C)
    shift = beta - rmean * scale
    hdw = jax.random.normal(ks[7], (3, 3, C), jnp.float32) * 0.1
    hpw = jax.random.normal(ks[8], (C, Co), jnp.float32) / np.sqrt(C)
    hpb = jax.random.normal(ks[9], (Co,), jnp.float32) * 0.05

    # Batch-invariant merged separable-conv weights (BN kept OUT of them):
    # merged[l, (t, c), co] = dw[l, t, c] * pw[l, c, co]  ->  w[l, co, (t, c)]
    merged = (dw[:, :, :, :, None] * pw[:, None, None, :, :]).reshape(L, 9 * C, C)
    w = jnp.transpose(merged, (0, 2, 1)).astype(jnp.bfloat16)            # (L, C, 9C)
    merged_h = (hdw[:, :, :, None] * hpw[None, None, :, :]).reshape(9 * C, Co)

    return dict(
        w=w,                                                 # (L, C, 9C)   bf16
        w_rest=w[1:],                                        # (L-1, C, 9C) bf16
        scale=scale[..., None].astype(jnp.float32),          # (5, L, C, 1) f32
        bias=(pwb[None] * scale + shift)[..., None].astype(jnp.float32),  # (5,L,C,1)
        hw=jnp.transpose(merged_h).astype(jnp.bfloat16),     # (Co, 9C)    bf16
        hb=hpb.reshape(Co, 1).astype(jnp.float32),           # (Co, 1)     f32
        raw=dict(dw=dw, pw=pw, pwb=pwb, bn_scale=scale, bn_shift=shift,
                 hdw=hdw, hpw=hpw, hpb=hpb),
    )


class EfficientDetHeadPallas:
    """JAX/Pallas equivalent of EfficientDetHead (cls_subnet + bbox_subnet)."""

    def __init__(self, in_channels, num_anchors, num_classes, num_layers, key):
        assert num_layers >= 2
        k_cls, k_box = jax.random.split(key)
        self.num_layers = num_layers
        self.cls_params = init_subnet_params(
            k_cls, in_channels, num_anchors * num_classes, num_layers)
        self.box_params = init_subnet_params(
            k_box, in_channels, num_anchors * 4, num_layers)
        # Fused layer-0 weight: classifier rows on top, regressor rows below.
        self.w0_joint = jnp.concatenate(
            [self.cls_params["w"][0], self.box_params["w"][0]], axis=0)  # (2C, 9C)

    def __call__(self, features):
        # features: list of NCHW arrays (FPN levels, high -> low resolution)
        logits, bbox_reg = [], []
        for f in features:
            l, b = run_head(f, self.w0_joint, self.cls_params, self.box_params)
            logits.append(l)            # classifier output (already sigmoid'ed)
            bbox_reg.append(b)
        return logits, bbox_reg


# ----------------------------------------------------------------------------
# Pure-JAX reference (f32, unmerged weights) for numerical validation
# ----------------------------------------------------------------------------
def ref_subnet(x_nchw, raw, *, num_layers, apply_sigmoid):
    N, C, H, W = x_nchw.shape
    outs = []
    for n in range(N):
        f = jnp.transpose(x_nchw[n], (1, 2, 0))[None].astype(jnp.float32)  # (1,H,W,C)
        for i in range(num_layers):
            f = lax.conv_general_dilated(
                f, raw["dw"][i].reshape(3, 3, 1, C), (1, 1), "SAME",
                dimension_numbers=("NHWC", "HWIO", "NHWC"),
                feature_group_count=C, precision=lax.Precision.HIGHEST)
            f = jnp.einsum("nhwc,cd->nhwd", f, raw["pw"][i],
                           precision=lax.Precision.HIGHEST) + raw["pwb"][i]
            f = f * raw["bn_scale"][n, i] + raw["bn_shift"][n, i]   # per-sample BN
            f = f * jax.nn.sigmoid(f)
        f = lax.conv_general_dilated(
            f, raw["hdw"].reshape(3, 3, 1, C), (1, 1), "SAME",
            dimension_numbers=("NHWC", "HWIO", "NHWC"),
            feature_group_count=C, precision=lax.Precision.HIGHEST)
        f = jnp.einsum("nhwc,cd->nhwd", f, raw["hpw"],
                       precision=lax.Precision.HIGHEST) + raw["hpb"]
        if apply_sigmoid:
            f = jax.nn.sigmoid(f)
        outs.append(jnp.transpose(f[0], (2, 0, 1)))
    return jnp.stack(outs, axis=0)


# ----------------------------------------------------------------------------
if __name__ == "__main__":
    key = jax.random.PRNGKey(0)

    # Small EfficientDet-D0-like configuration
    in_channels = 32
    num_anchors = 9
    num_classes = 4
    scale_coef = 0
    num_layers = BOXCLS_LAYERS_BY_COEF[scale_coef]   # 3
    N = 2                                            # batch (torch code implies N <= 5)

    kp, kf1, kf2 = jax.random.split(key, 3)
    head = EfficientDetHeadPallas(in_channels, num_anchors, num_classes,
                                  num_layers, kp)

    # FPN features, NCHW, high to low resolution.  Spatial sizes chosen so
    # H*W is a multiple of the 128-lane vreg width (lane-dense tiles/stores).
    features = [
        jax.random.normal(kf1, (N, in_channels, 16, 16), jnp.float32),
        jax.random.normal(kf2, (N, in_channels, 8, 16), jnp.float32),
    ]

    logits, bbox_reg = head(features)
    logits = [jax.block_until_ready(l) for l in logits]
    bbox_reg = [jax.block_until_ready(b) for b in bbox_reg]

    # shape checks: (N, A*K, H, W) and (N, A*4, H, W)
    for f, l, b in zip(features, logits, bbox_reg):
        Nf, _, H, W = f.shape
        assert l.shape == (Nf, num_anchors * num_classes, H, W), l.shape
        assert b.shape == (Nf, num_anchors * 4, H, W), b.shape

    # numerical check against the pure-JAX f32 reference (tolerance covers the
    # bf16 matmul path of the kernel)
    for f, l, b in zip(features, logits, bbox_reg):
        l_ref = ref_subnet(f, head.cls_params["raw"], num_layers=num_layers,
                           apply_sigmoid=True)
        b_ref = ref_subnet(f, head.box_params["raw"], num_layers=num_layers,
                           apply_sigmoid=False)
        np.testing.assert_allclose(np.asarray(l), np.asarray(l_ref),
                                   rtol=3e-2, atol=3e-2)
        np.testing.assert_allclose(np.asarray(b), np.asarray(b_ref),
                                   rtol=3e-2, atol=3e-2)

    print("KERNEL_OK")
</pallas_src>

<mosaic_0001>
module attributes {stable_mosaic.version = 11 : i64} {
  func.func @probe(%arg0: memref<8x128xf32, #tpu.memory_space<vmem>>, %arg1: memref<8x128xf32, #tpu.memory_space<vmem>>) attributes {dimension_semantics = [], scalar_prefetch = 0 : i64, scratch_operands = 0 : i64, tpu.core_type = #tpu.core_type<tc>} {
    %c0 = arith.constant 0 : index
    %c0_0 = arith.constant 0 : index
    %0 = vector.load %arg0[%c0, %c0_0] : memref<8x128xf32, #tpu.memory_space<vmem>>, vector<8x128xf32>
    %c1_i32 = arith.constant 1 : i32
    %1 = tpu.dynamic_rotate %0 by %c1_i32 dim 1 : vector<8x128xf32>, i32 -> vector<8x128xf32>
    %c0_1 = arith.constant 0 : index
    %c0_2 = arith.constant 0 : index
    %2 = vector.load %arg1[%c0_1, %c0_2] : memref<8x128xf32, #tpu.memory_space<vmem>>, vector<8x128xf32>
    tpu.vector_store %arg1[%c0_1, %c0_2], %1 {strides = array<i32>} : memref<8x128xf32, #tpu.memory_space<vmem>>, vector<8x128xf32>,
    return
  }
}

</mosaic_0001>

<bundles_post_ra>
// kernel: tpu_custom_call.1
= control target key start
LH: loop header
LB: loop body
LE: loop exit
PB: predicated region body
PF: predicated region fallthrough
CT: control target
= control target key end

     0   :  { %6 = vsyncpa [#allocation3], 0  ;;  %s118_s0 = inlined_call_operand.hbm [shape: f32[8,128], index: 0, kind: input, shape index: {}]   ;;  %s119_s1 = inlined_call_operand.hbm [shape: f32[8,128], index: 1, kind: output, shape index: {}]  }
   0x1   :  { %7 = vsyncpa [#allocation4], 0  ;;  %s13_s8 = sshll.u32 %s118_s0, 4  ;;  %s99_s9 = smov [#allocation2]   ;;  %s14_s8 = int_to_ptr.hbm [resolvable:$true] %s13_s8 }
   0x2   :  { %s15_s10 = sshll.u32 %s99_s9, 4  ;;  %s16_s10 = int_to_ptr.vmem [resolvable:$true] %s15_s10 }
   0x3   :  { %18 = dma.hbm_to_vmem [thread:$0]  %s14_s8, 128, %s16_s10, [#allocation3]  }
   0x4   :  { %95 = dma.done.wait [#allocation3], 128  }
   0x5   :  { %96 = vsyncadd [#allocation3], 4294967168  ;;  %v23_v0 = vld [vmem:[#allocation2] sm:$0xff]  ;;  %s100_s11 = smov 1   ;;  %s101_s12 = smov [#allocation5]  }
   0x6   :  { %24 = vrot.lane.b32.xlu0 %v23_v0, %s100_s11  ;;  %s32_s13 = sshll.u32 %s101_s12, 4  ;;  %s34_s16 = sshll.u32 %s119_s1, 4  ;;  %s33_s13 = int_to_ptr.vmem [resolvable:$true] %s32_s13  ;;  %s35_s16 = int_to_ptr.hbm [resolvable:$true] %s34_s16 }
  0x78   :  { %v25_v1 = vpop.permute.xlu0 %24 }
  0x79   :  { %26 = vst [vmem:[#allocation5] sm:$0xff] %v25_v1 }
  0x7a   :  { %37 = dma.vmem_to_hbm [thread:$0]  %s33_s13, 128, %s35_s16, [#allocation4]  }
  0x7b   :  { %97 = dma.done.wait [#allocation4], 128  }
  0x7c   :  { %98 = vsyncadd [#allocation4], 4294967168 }
  0x7d   :  { %42 = vsyncpa [#allocation3], 1 }
  0x7e   :  { %43 = vsyncpa [#allocation4], 1 }

</bundles_post_ra>
